<compile_context>
chip_gen: v7x
topology: tpu7x:2x2x1
jax: 0.10.0
libtpu: 0.0.40
codegen_flags: <defaults>
</compile_context>

<pallas_src>
import math
from functools import partial

import jax
import jax.numpy as jnp
from jax.experimental import pallas as pl
from jax.experimental.pallas import tpu as pltpu

PAD = 128  # lane-padded feature width for the hidden layers


def _round_up(n, m):
    return ((n + m - 1) // m) * m


def _mlp_kernel(x_ref, w1_ref, b1_ref, *refs):
    """x_ref: (TB, din).  w1_ref: (din, PAD) rows of W1^T.  b1_ref: (1, PAD).
    refs = (w2, b2, ..., w_last_row, b_last_scalar, o_ref)."""
    *mid, w_last_ref, b_last_ref, o_ref = refs
    din = x_ref.shape[-1]
    x = x_ref[...]

    # --- Layer 1 (fc1 + ReLU): VPU rank-`din` update, no MXU, no scratch. ---
    h = x[:, 0:1] * w1_ref[0:1, :]
    for k in range(1, din):
        h = h + x[:, k:k + 1] * w1_ref[k:k + 1, :]
    h = jnp.maximum(h + b1_ref[...], 0.0)          # (TB, PAD); padded lanes stay 0

    # --- Middle hidden layers (fc2..): resident 128x128 MXU matmuls + ReLU. ---
    n_mid = len(mid) // 2
    for li in range(n_mid):
        w = mid[2 * li][...]
        b = mid[2 * li + 1][...]
        h = jnp.maximum(jnp.dot(h, w, preferred_element_type=jnp.float32) + b, 0.0)

    # --- Fused trailing pair (fc3 o fc4, no activation between): lane reduce. ---
    out = jnp.sum(h * w_last_ref[...], axis=-1, keepdims=True) + b_last_ref[...]
    o_ref[...] = jnp.maximum(out, 0.0).astype(o_ref.dtype)   # final torch.relu


def prepare_params(params):
    """Pad / fuse torch-convention params ONCE, outside the per-call path.

    params: list of (W, b) with W shaped (out, in) like torch.nn.Linear.
    Returns (tuple_of_prepacked_arrays, out_size):
      [0] (din, PAD) rows of W1^T          [1] (1, PAD) b1
      [...] (PAD, PAD) / (1, PAD) pairs for the middle hidden layers
      [-2] (1, PAD) fused (fc_last-1 o fc_last) weight row
      [-1] (1, 1)  fused bias
    """
    params = [(jnp.asarray(W, jnp.float32), jnp.asarray(b, jnp.float32))
              for (W, b) in params]
    assert len(params) >= 3, "expects >=2 hidden layers (Net_Arc default has 3)"

    (W1, b1) = params[0]
    h1, din = W1.shape
    w1_rows = jnp.zeros((din, PAD), jnp.float32).at[:, :h1].set(W1.T)
    b1_row = jnp.zeros((1, PAD), jnp.float32).at[0, :h1].set(b1)
    packed = [w1_rows, b1_row]

    # Middle hidden layers (ReLU after each): padded 128x128 matmul weights.
    for (W, b) in params[1:-2]:
        do, di = W.shape
        wp = jnp.zeros((PAD, PAD), jnp.float32).at[:di, :do].set(W.T)
        bp = jnp.zeros((1, PAD), jnp.float32).at[0, :do].set(b)
        packed += [wp, bp]

    # Fuse the trailing no-activation pair (exact up to f32 rounding).
    (Wa, ba), (Wb, bb) = params[-2], params[-1]
    W_eff = Wb @ Wa            # (out, h_{n-1})
    b_eff = Wb @ ba + bb       # (out,)
    out_size = W_eff.shape[0]
    assert out_size == 1, "fused lane-reduce path assumes output_size == 1"
    w_last = jnp.zeros((1, PAD), jnp.float32).at[0, :W_eff.shape[1]].set(W_eff[0])
    b_last = b_eff.reshape(1, 1)
    packed += [w_last, b_last]
    return tuple(packed), out_size


@partial(jax.jit, static_argnames=("out_size", "block_rows"))
def net_arc_forward(x, padded_params, *, out_size, block_rows=2048):
    """x: (B, input_size) float32.  padded_params: output of prepare_params."""
    assert block_rows % 8 == 0
    B, din = x.shape
    x = x.astype(jnp.float32)

    # Batch tiling: for B >= 16 aim for >= 2 tiles (8-aligned) so v7x's two
    # TensorCores both get work; otherwise one block equal to the full batch.
    if B >= 16:
        TB = min(block_rows, _round_up(pl.cdiv(B, 2), 8))
    else:
        TB = B
    grid = (pl.cdiv(B, TB),)

    in_specs = [pl.BlockSpec((TB, din), lambda i: (i, 0))]      # x: batch-tiled
    for p in padded_params:                                     # weights: resident
        in_specs.append(pl.BlockSpec(p.shape, lambda i: (0, 0)))

    n_mid = (len(padded_params) - 4) // 2
    flops = 2 * B * PAD * (din + n_mid * PAD + 1)
    bytes_accessed = 4 * (B * din + B * out_size
                          + sum(int(p.size) for p in padded_params))

    # NOTE: if block_rows is raised past ~4096, set
    # pltpu.CompilerParams(vmem_limit_bytes=...) — the lane-sparse (TB, din)
    # and (TB, 1) blocks each occupy TB*128*4 bytes per pipeline buffer.
    return pl.pallas_call(
        _mlp_kernel,
        out_shape=jax.ShapeDtypeStruct((B, out_size), jnp.float32),
        grid_spec=pltpu.PrefetchScalarGridSpec(
            num_scalar_prefetch=0,
            grid=grid,
            in_specs=in_specs,
            out_specs=pl.BlockSpec((TB, out_size), lambda i: (i, 0)),
        ),
        compiler_params=pltpu.CompilerParams(
            dimension_semantics=("parallel",),   # batch tiles -> v7x megacore
        ),
        cost_estimate=pl.CostEstimate(flops=flops, transcendentals=0,
                                      bytes_accessed=bytes_accessed),
    )(x, *padded_params)


def xavier_uniform(key, fan_out, fan_in):
    limit = math.sqrt(6.0 / (fan_in + fan_out))
    return jax.random.uniform(key, (fan_out, fan_in), jnp.float32, -limit, limit)


def make_params(key, input_size=2, hidden_layer_sizes=(3, 4, 5), output_size=1):
    sizes = [input_size, *hidden_layer_sizes, output_size]
    params = []
    for i in range(len(sizes) - 1):
        key, sub = jax.random.split(key)
        W = xavier_uniform(sub, sizes[i + 1], sizes[i])  # torch convention (out, in)
        b = jnp.zeros((sizes[i + 1],), jnp.float32)      # zeros_ init
        params.append((W, b))
    return params


def reference_forward(x, params):
    """Pure-JAX, unfused replica of Net_Arc.forward (the PyTorch semantics)."""
    h = x.astype(jnp.float32)
    n_hidden = len(params) - 1      # = len(hidden_layer_sizes)
    for i, (W, b) in enumerate(params, start=1):
        h = h @ W.T + b
        if i < n_hidden:            # activation only while i < len(hidden)
            h = jnp.maximum(h, 0.0)
    return jnp.maximum(h, 0.0)      # final torch.relu


# TODO(synk): the stateful `n_forward_calls` counter and the host-side
# train/predict loops are Python bookkeeping, not kernel work; not translated.

if __name__ == "__main__":
    key = jax.random.PRNGKey(0)
    kx, kx2, kp = jax.random.split(key, 3)

    input_size = 2
    hidden_layer_sizes = (3, 4, 5)
    output_size = 1
    params = make_params(kp, input_size, hidden_layer_sizes, output_size)
    padded_params, out_size = prepare_params(params)   # done once, reused per call

    # Small demo batch: single-tile path.
    B = 8
    x = jax.random.normal(kx, (B, input_size), jnp.float32)
    y = net_arc_forward(x, padded_params, out_size=out_size)
    jax.block_until_ready(y)
    y_ref = reference_forward(x, params)
    assert y.shape == (B, output_size)
    assert jnp.allclose(y, y_ref, atol=1e-5, rtol=1e-5), "mismatch vs reference (B=8)"

    # Larger batch: exercises the multi-tile grid + ragged last block.
    B2 = 40
    x2 = jax.random.normal(kx2, (B2, input_size), jnp.float32)
    y2 = net_arc_forward(x2, padded_params, out_size=out_size)
    jax.block_until_ready(y2)
    y2_ref = reference_forward(x2, params)
    assert y2.shape == (B2, output_size)
    assert jnp.allclose(y2, y2_ref, atol=1e-5, rtol=1e-5), "mismatch vs reference (B=40)"

    print("KERNEL_OK")
</pallas_src>

<mosaic_0001>
module attributes {stable_mosaic.version = 11 : i64} {
  func.func @_mlp_kernel(%arg0: i32, %arg1: memref<8x2xf32, #tpu.memory_space<vmem>>, %arg2: memref<2x128xf32, #tpu.memory_space<vmem>>, %arg3: memref<1x128xf32, #tpu.memory_space<vmem>>, %arg4: memref<128x128xf32, #tpu.memory_space<vmem>>, %arg5: memref<1x128xf32, #tpu.memory_space<vmem>>, %arg6: memref<1x128xf32, #tpu.memory_space<vmem>>, %arg7: memref<1x1xf32, #tpu.memory_space<vmem>>, %arg8: memref<8x1xf32, #tpu.memory_space<vmem>>) attributes {dimension_semantics = [#tpu.dimension_semantics<parallel>], iteration_bounds = array<i64: 1>, scalar_prefetch = 0 : i64, scratch_operands = 0 : i64, tpu.core_type = #tpu.core_type<tc>, window_params = [{transform_indices = @transform_0, window_bounds = array<i64: 8, 2>}, {pipeline_mode = #tpu.pipeline_mode<synchronous>, transform_indices = @transform_1, window_bounds = array<i64: 2, 128>}, {pipeline_mode = #tpu.pipeline_mode<synchronous>, transform_indices = @transform_2, window_bounds = array<i64: 1, 128>}, {pipeline_mode = #tpu.pipeline_mode<synchronous>, transform_indices = @transform_3, window_bounds = array<i64: 128, 128>}, {pipeline_mode = #tpu.pipeline_mode<synchronous>, transform_indices = @transform_4, window_bounds = array<i64: 1, 128>}, {pipeline_mode = #tpu.pipeline_mode<synchronous>, transform_indices = @transform_5, window_bounds = array<i64: 1, 128>}, {pipeline_mode = #tpu.pipeline_mode<synchronous>, transform_indices = @transform_6, window_bounds = array<i64: 1, 1>}, {transform_indices = @transform_7, window_bounds = array<i64: 8, 1>}]} {
    %c0 = arith.constant 0 : index
    %c0_0 = arith.constant 0 : index
    %0 = vector.load %arg1[%c0, %c0_0] : memref<8x2xf32, #tpu.memory_space<vmem>>, vector<8x2xf32>
    %1 = vector.extract_strided_slice %0 {offsets = [0, 0], sizes = [8, 1], strides = [1, 1]} : vector<8x2xf32> to vector<8x1xf32>
    %c0_1 = arith.constant 0 : index
    %c0_2 = arith.constant 0 : index
    %2 = vector.load %arg2[%c0_1, %c0_2] : memref<2x128xf32, #tpu.memory_space<vmem>>, vector<1x128xf32>
    %3 = vector.broadcast %1 : vector<8x1xf32> to vector<8x128xf32>
    %4 = vector.broadcast %2 : vector<1x128xf32> to vector<8x128xf32>
    %5 = arith.mulf %3, %4 : vector<8x128xf32>
    %6 = vector.extract_strided_slice %0 {offsets = [0, 1], sizes = [8, 1], strides = [1, 1]} : vector<8x2xf32> to vector<8x1xf32>
    %c1 = arith.constant 1 : index
    %c0_3 = arith.constant 0 : index
    %7 = vector.load %arg2[%c1, %c0_3] : memref<2x128xf32, #tpu.memory_space<vmem>>, vector<1x128xf32>
    %8 = vector.broadcast %6 : vector<8x1xf32> to vector<8x128xf32>
    %9 = vector.broadcast %7 : vector<1x128xf32> to vector<8x128xf32>
    %10 = arith.mulf %8, %9 : vector<8x128xf32>
    %11 = arith.addf %5, %10 : vector<8x128xf32>
    %c0_4 = arith.constant 0 : index
    %c0_5 = arith.constant 0 : index
    %12 = vector.load %arg3[%c0_4, %c0_5] : memref<1x128xf32, #tpu.memory_space<vmem>>, vector<1x128xf32>
    %13 = vector.broadcast %12 : vector<1x128xf32> to vector<8x128xf32>
    %14 = arith.addf %11, %13 : vector<8x128xf32>
    %cst = arith.constant 0.000000e+00 : f32
    %15 = vector.broadcast %cst : f32 to vector<8x128xf32>
    %16 = arith.maximumf %14, %15 : vector<8x128xf32>
    %c0_6 = arith.constant 0 : index
    %c0_7 = arith.constant 0 : index
    %17 = vector.load %arg4[%c0_6, %c0_7] : memref<128x128xf32, #tpu.memory_space<vmem>>, vector<128x128xf32>
    %c0_8 = arith.constant 0 : index
    %c0_9 = arith.constant 0 : index
    %18 = vector.load %arg5[%c0_8, %c0_9] : memref<1x128xf32, #tpu.memory_space<vmem>>, vector<1x128xf32>
    %cst_10 = arith.constant dense<0.000000e+00> : vector<8x128xf32>
    %19 = tpu.matmul %16, %17, %cst_10 {dimension_numbers = #tpu.dot_dimension_numbers<[1], [0], [0], [1], [0, 0, 1, 1], [], []>} : vector<8x128xf32>, vector<128x128xf32>, vector<8x128xf32> -> vector<8x128xf32>
    %20 = vector.broadcast %18 : vector<1x128xf32> to vector<8x128xf32>
    %21 = arith.addf %19, %20 : vector<8x128xf32>
    %cst_11 = arith.constant 0.000000e+00 : f32
    %22 = vector.broadcast %cst_11 : f32 to vector<8x128xf32>
    %23 = arith.maximumf %21, %22 : vector<8x128xf32>
    %c0_12 = arith.constant 0 : index
    %c0_13 = arith.constant 0 : index
    %24 = vector.load %arg6[%c0_12, %c0_13] : memref<1x128xf32, #tpu.memory_space<vmem>>, vector<1x128xf32>
    %25 = vector.broadcast %24 : vector<1x128xf32> to vector<8x128xf32>
    %26 = arith.mulf %23, %25 : vector<8x128xf32>
    %cst_14 = arith.constant dense<0.000000e+00> : vector<8xf32>
    %27 = vector.multi_reduction <add>, %26, %cst_14 [1] : vector<8x128xf32> to vector<8xf32>
    %28 = vector.shape_cast %27 : vector<8xf32> to vector<8x1xf32>
    %c0_15 = arith.constant 0 : index
    %c0_16 = arith.constant 0 : index
    %29 = vector.load %arg7[%c0_15, %c0_16] : memref<1x1xf32, #tpu.memory_space<vmem>>, vector<1x1xf32>
    %30 = vector.broadcast %29 : vector<1x1xf32> to vector<8x1xf32>
    %31 = arith.addf %28, %30 : vector<8x1xf32>
    %cst_17 = arith.constant 0.000000e+00 : f32
    %32 = vector.broadcast %cst_17 : f32 to vector<8x1xf32>
    %33 = arith.maximumf %31, %32 : vector<8x1xf32>
    %c0_18 = arith.constant 0 : index
    %c0_19 = arith.constant 0 : index
    %34 = vector.load %arg8[%c0_18, %c0_19] : memref<8x1xf32, #tpu.memory_space<vmem>>, vector<8x1xf32>
    tpu.vector_store %arg8[%c0_18, %c0_19], %33 {strides = array<i32>} : memref<8x1xf32, #tpu.memory_space<vmem>>, vector<8x1xf32>,
    return
  }
  func.func @transform_0(%arg0: i32) -> (i32, i32) {
    %c0_i32 = arith.constant 0 : i32
    %c0_i32_0 = arith.constant 0 : i32
    return %arg0, %c0_i32 : i32, i32
  }
  func.func @transform_1(%arg0: i32) -> (i32, i32) {
    %c0_i32 = arith.constant 0 : i32
    %c0_i32_0 = arith.constant 0 : i32
    %c0_i32_1 = arith.constant 0 : i32
    return %c0_i32, %c0_i32_0 : i32, i32
  }
  func.func @transform_2(%arg0: i32) -> (i32, i32) {
    %c0_i32 = arith.constant 0 : i32
    %c0_i32_0 = arith.constant 0 : i32
    %c0_i32_1 = arith.constant 0 : i32
    return %c0_i32, %c0_i32_0 : i32, i32
  }
  func.func @transform_3(%arg0: i32) -> (i32, i32) {
    %c0_i32 = arith.constant 0 : i32
    %c0_i32_0 = arith.constant 0 : i32
    %c0_i32_1 = arith.constant 0 : i32
    return %c0_i32, %c0_i32_0 : i32, i32
  }
  func.func @transform_4(%arg0: i32) -> (i32, i32) {
    %c0_i32 = arith.constant 0 : i32
    %c0_i32_0 = arith.constant 0 : i32
    %c0_i32_1 = arith.constant 0 : i32
    return %c0_i32, %c0_i32_0 : i32, i32
  }
  func.func @transform_5(%arg0: i32) -> (i32, i32) {
    %c0_i32 = arith.constant 0 : i32
    %c0_i32_0 = arith.constant 0 : i32
    %c0_i32_1 = arith.constant 0 : i32
    return %c0_i32, %c0_i32_0 : i32, i32
  }
  func.func @transform_6(%arg0: i32) -> (i32, i32) {
    %c0_i32 = arith.constant 0 : i32
    %c0_i32_0 = arith.constant 0 : i32
    %c0_i32_1 = arith.constant 0 : i32
    return %c0_i32, %c0_i32_0 : i32, i32
  }
  func.func @transform_7(%arg0: i32) -> (i32, i32) {
    %c0_i32 = arith.constant 0 : i32
    %c0_i32_0 = arith.constant 0 : i32
    return %arg0, %c0_i32 : i32, i32
  }
}

</mosaic_0001>

<bundles_post_ra>
// kernel: net_arc_forward.1
= control target key start
LH: loop header
LB: loop body
LE: loop exit
PB: predicated region body
PF: predicated region fallthrough
CT: control target
= control target key end

     0   :  { %s394_s0 = inlined_call_operand.vmem [shape: f32[8,2], index: 0, kind: input, shape index: {}]   ;;  %s395_s1 = inlined_call_operand.vmem [shape: f32[2,128], index: 1, kind: input, shape index: {}]   ;;  %s396_s2 = inlined_call_operand.vmem [shape: f32[1,128], index: 2, kind: input, shape index: {}]   ;;  %s397_s3 = inlined_call_operand.hbm [shape: f32[128,128], index: 3, kind: input, shape index: {}]   ;;  %s398_s4 = inlined_call_operand.vmem [shape: f32[1,128], index: 4, kind: input, shape index: {}]   ;;  %s399_s5 = inlined_call_operand.vmem [shape: f32[1,128], index: 5, kind: input, shape index: {}]   ;;  %s400_s6 = inlined_call_operand.<no memory space> [shape: f32[1,1], index: 6, kind: input, shape index: {}]   ;;  %s401_s7 = inlined_call_operand.vmem [shape: f32[8,1], index: 7, kind: output, shape index: {}]  }
   0x1   :  { %v12_v0 = vstv %s400_s6 }
   0x2   :  { %13 = vst [vmem:[#allocation2] sm:$0x1] %v12_v0 }
   0x3   :  { %14 = vsyncpa [#allocation4], 0  ;;  %s310_s26 = smov [#allocation3]   ;;  %s286_s30 = scalar_lea.hbm %s397_s3, 2048 }
   0x4   :  { %s26_s27 = sshll.u32 %s310_s26, 4  ;;  %p287_p0 = scmp.ne.s32.totalorder %s397_s3, %s286_s30  ;;  %s27_s27 = int_to_ptr.vmem [resolvable:$true] %s26_s27 }
   0x5   :  { %p290_p1 = scmp.lt.u32.totalorder %s286_s30, %s397_s3 }
   0x7   :  { %p292_p2 = pnand %p290_p1, %p287_p0 }
   0x9   :  { %295 = shalt.err (!%p292_p2)
}
   0xa   :  { %s296_s6 = scalar_lea.vmem %s27_s27, 2048  ;;  %p301_p4 = scmp.lt.s32.totalorder %s27_s27, %s27_s27 }
   0xb   :  { %p297_p3 = scmp.ne.s32.totalorder %s27_s27, %s296_s6  ;;  %p302_p5 = scmp.lt.s32.totalorder %s296_s6, %s296_s6 }
   0xd   :  { %p303_p6 = por %p302_p5, %p301_p4 }
   0xf   :  { %p304_p7 = pnand %p303_p6, %p297_p3 }
  0x11   :  { %307 = shalt.err (!%p304_p7)
}
  0x12   :  { %s311_s12 = smov 128   ;;  %s312_s13 = smov 8  }
  0x13   :  { %32 = dma.hbm_to_vmem [thread:$0]  %s397_s3, 2048, %s27_s27, [#allocation4], %s311_s12, %s311_s12, %s312_s13  }
  0x14   :  { %308 = dma.done.wait [#allocation4], 2048  }
  0x15   :  { %309 = vsyncadd [#allocation4], 4294965248  ;;  %v313_v1 = vmov 0   ;;  %v314_v2 = vmov 0.0|0.0   ;;  %v42_v3 = vld [vmem:[%s394_s0] sm:$0xff]  ;;  %v75_v5 = vld [vmem:[#allocation3 + $0x8] sm:$0xff] }
  0x16   :  { %284 = vset.pattern.permute.xlu0 %v313_v1  ;;  %252 = vmatprep.subr.bf16.mxu0 %v314_v2  ;;  %v74_v4 = vld [vmem:[#allocation3] sm:$0xff]  ;;  %v76_v7 = vld [vmem:[#allocation3 + $0x10] sm:$0xff]  ;;  %v77_v8 = vld [vmem:[#allocation3 + $0x18] sm:$0xff]  ;;  %v315_v12 = vmov 1   ;;  %vm316_vm0 = vmmov 0   ;;  %v317_v16 = vmov 0.0  }
  0x17   :  { %46 = vperm.xlu0 %284, %v42_v3   ;;  %v253_v6 = vpack.c.bf16 %v75_v5, %v74_v4  ;;  %v256_v9 = vpack.c.bf16 %v77_v8, %v76_v7  ;;  %v78_v10 = vld [vmem:[#allocation3 + $0x20] sm:$0xff]  ;;  %v79_v11 = vld [vmem:[#allocation3 + $0x28] sm:$0xff]  ;;  %v80_v14 = vld [vmem:[#allocation3 + $0x30] sm:$0xff]  ;;  %249 = vmatprep.mubr.msk.f32.mxu0 %vm316_vm0, %v317_v16  ;;  %vm187_vm1 = vcmask 7168  }
  0x18   :  { %v259_v13 = vpack.c.bf16 %v79_v11, %v78_v10  ;;  %v81_v15 = vld [vmem:[#allocation3 + $0x38] sm:$0xff]  ;;  %v82_v18 = vld [vmem:[#allocation3 + $0x40] sm:$0xff]  ;;  %v83_v19 = vld [vmem:[#allocation3 + $0x48] sm:$0xff] }
  0x19   :  { %254 = vmatpush3.bf16.msra.mxu0 %v253_v6  ;;  %v262_v17 = vpack.c.bf16 %v81_v15, %v80_v14  ;;  %v265_v20 = vpack.c.bf16 %v83_v19, %v82_v18  ;;  %v84_v21 = vld [vmem:[#allocation3 + $0x50] sm:$0xff]  ;;  %v85_v22 = vld [vmem:[#allocation3 + $0x58] sm:$0xff]  ;;  %v86_v24 = vld [vmem:[#allocation3 + $0x60] sm:$0xff] }
  0x1a   :  { %255 = vmatprep.subr.bf16.mxu0 %v314_v2  ;;  %v268_v23 = vpack.c.bf16 %v85_v22, %v84_v21  ;;  %v87_v25 = vld [vmem:[#allocation3 + $0x68] sm:$0xff]  ;;  %v88_v27 = vld [vmem:[#allocation3 + $0x70] sm:$0xff]  ;;  %v89_v28 = vld [vmem:[#allocation3 + $0x78] sm:$0xff] }
  0x1b   :  { %285 = vset.pattern.permute.xlu0 %v315_v12  ;;  %v271_v26 = vpack.c.bf16 %v87_v25, %v86_v24  ;;  %v274_v29 = vpack.c.bf16 %v89_v28, %v88_v27  ;;  %v194_v31 = vld [vmem:[%s395_s1] ss:$0 sm:$0xff]  ;;  %v195_v32 = vld [vmem:[%s395_s1 + $0x1] ss:$0 sm:$0xff] }
  0x1c   :  { %56 = vperm.xlu0 %285, %v42_v3   ;;  %v196_v36 = vld [vmem:[%s396_s2] ss:$0 sm:$0xff] }
  0x1d   :  { %257 = vmatpush3.bf16.msra.mxu0 %v256_v9  ;;  %v197_v40 = vld [vmem:[%s398_s4] ss:$0 sm:$0xff] }
  0x1e   :  { %258 = vmatprep.subr.bf16.mxu0 %v314_v2  ;;  %v198_v44 = vld [vmem:[%s399_s5] ss:$0 sm:$0xff] }
  0x1f   :  { %v199_v47 = vld [vmem:[#allocation2] ss:$0 sm:$0xff] }
  0x21   :  { %260 = vmatpush3.bf16.msra.mxu0 %v259_v13 }
  0x22   :  { %261 = vmatprep.subr.bf16.mxu0 %v314_v2 }
  0x25   :  { %263 = vmatpush3.bf16.msra.mxu0 %v262_v17 }
  0x26   :  { %264 = vmatprep.subr.bf16.mxu0 %v314_v2 }
  0x29   :  { %266 = vmatpush3.bf16.msra.mxu0 %v265_v20 }
  0x2a   :  { %267 = vmatprep.subr.bf16.mxu0 %v314_v2 }
  0x2d   :  { %269 = vmatpush3.bf16.msra.mxu0 %v268_v23 }
  0x2e   :  { %270 = vmatprep.subr.bf16.mxu0 %v314_v2 }
  0x31   :  { %272 = vmatpush3.bf16.msra.mxu0 %v271_v26 }
  0x32   :  { %273 = vmatprep.subr.bf16.mxu0 %v314_v2 }
  0x35   :  { %275 = vmatpush3.bf16.msra.mxu0 %v274_v29 }
  0x96   :  { %v47_v30 = vpop.permute.xlu0 %46 }
  0x97   :  { %v53_v34 = vmul.f32 %v194_v31, %v47_v30 }
  0x9b   :  { %v57_v33 = vpop.permute.xlu0 %56 }
  0x9c   :  { %v63_v35 = vmul.f32 %v195_v32, %v57_v33 }
  0x9e   :  { %v64_v37 = vadd.f32 %v63_v35, %v53_v34 }
  0xa0   :  { %v72_v38 = vadd.f32 %v196_v36, %v64_v37 }
  0xa2   :  { %v73_v39 = vmax.f32 %v72_v38, 0.0 }
  0xa4   :  { %250 = vmatmul.mubr.f32.vlgmr.msra.gmra.mrb[0].mxu0 %v73_v39 }
 0x177   :  { %v163_v41 = vpop.f32.mrb[0].mxu0 }
 0x178   :  { %v164_v42 = vadd.f32 %v197_v40, %v163_v41  ;;  %v251_v43 = vpop.f32.mrb[1].mxu0 }
 0x17a   :  { %v167_v45 = vmax.f32 %v164_v42, 0.0 }
 0x17c   :  { %v175_v46 = vmul.f32 %v198_v44, %v167_v45 }
 0x17e   :  { %176 = vadd.xlane.f32.xlu1 %v175_v46 }
 0x20b   :  { %v177_v48 = vpop.xlane.xlu1 %176 }
 0x20c   :  { %v185_v49 = vadd.f32 %v199_v47, %v177_v48 }
 0x20e   :  { %v186_v50 = vmax.f32 %v185_v49, 0.0 }
 0x210   :  { %188 = vst.msk [vmem:[%s401_s7] sm:$0xff] %vm187_vm1, %v186_v50 }
 0x211   :  { %193 = vsyncpa [#allocation4], 1 }

</bundles_post_ra>
